<compile_context>
chip_gen: v5e
topology: v5e:2x2
jax: 0.10.0
libtpu: 0.0.40
codegen_flags: <defaults>
</compile_context>

<pallas_src>
import functools

import jax
import jax.numpy as jnp
from jax.experimental import pallas as pl
from jax.experimental.pallas import tpu as pltpu

LANE = 128  # TPU lane width


def _round_up(n: int, m: int) -> int:
    return ((n + m - 1) // m) * m


def mlp_kernel(x_ref, w1_ref, b1_ref, w2_ref, b2_ref, o_ref):
    # x:  [TILE_B, D_in]        (one batch tile, streamed)
    # w1: [D_in, H_pad]         (resident, already transposed + padded)
    # b1: [1, H_pad]
    # w2: [H_pad, C_pad]        (resident, already transposed + padded)
    # b2: [1, C_pad]
    # o:  [TILE_B, C_pad]       (lane-dense store)
    x = x_ref[...]
    h = jnp.dot(x, w1_ref[...], preferred_element_type=jnp.float32) + b1_ref[...]
    h = jnp.maximum(h, 0.0)  # ReLU (padded hidden cols stay exactly 0)
    out = jnp.dot(h, w2_ref[...], preferred_element_type=jnp.float32) + b2_ref[...]
    o_ref[...] = out.astype(o_ref.dtype)


@functools.partial(jax.jit, static_argnames=("tile_b",))
def neural_network_forward(x, w1, b1, w2, b2, *, tile_b=1024):
    """Forward pass of Linear->ReLU->Linear.

    x:  [B, D_in] f32
    w1: [H, D_in] f32 (PyTorch nn.Linear layout), b1: [H]
    w2: [C, H]   f32,                             b2: [C]
    returns [B, C] f32
    """
    B, D_in = x.shape
    H = w1.shape[0]
    C = w2.shape[0]

    # --- wrapper-side layout plumbing (free, outside the kernel) -----------
    H_pad = _round_up(H, LANE)
    C_pad = _round_up(C, LANE)

    # Pre-transpose to MXU-friendly [K, N] layout and zero-pad N dims.
    w1t = jnp.zeros((D_in, H_pad), jnp.float32).at[:, :H].set(w1.T)
    b1p = jnp.zeros((1, H_pad), jnp.float32).at[0, :H].set(b1)
    w2t = jnp.zeros((H_pad, C_pad), jnp.float32).at[:H, :C].set(w2.T)
    b2p = jnp.zeros((1, C_pad), jnp.float32).at[0, :C].set(b2)

    # Batch tiling: biggest tile that keeps things simple; pad B to a multiple.
    TILE_B = min(tile_b, _round_up(B, 8))
    B_pad = _round_up(B, TILE_B)
    if B_pad != B:
        x = jnp.zeros((B_pad, D_in), x.dtype).at[:B, :].set(x)
    grid = (B_pad // TILE_B,)

    cost = pl.CostEstimate(
        flops=2 * B_pad * (D_in * H_pad + H_pad * C_pad),
        transcendentals=0,
        bytes_accessed=(x.size + w1t.size + b1p.size + w2t.size + b2p.size
                        + B_pad * C_pad) * 4,
    )

    out = pl.pallas_call(
        mlp_kernel,
        out_shape=jax.ShapeDtypeStruct((B_pad, C_pad), jnp.float32),
        grid=grid,
        in_specs=[
            pl.BlockSpec((TILE_B, D_in), lambda i: (i, 0)),   # x: streamed
            pl.BlockSpec((D_in, H_pad), lambda i: (0, 0)),    # w1: resident
            pl.BlockSpec((1, H_pad), lambda i: (0, 0)),       # b1: resident
            pl.BlockSpec((H_pad, C_pad), lambda i: (0, 0)),   # w2: resident
            pl.BlockSpec((1, C_pad), lambda i: (0, 0)),       # b2: resident
        ],
        out_specs=pl.BlockSpec((TILE_B, C_pad), lambda i: (i, 0)),
        compiler_params=pltpu.CompilerParams(
            dimension_semantics=("parallel",),  # shards batch across TCs on v7x
        ),
        cost_estimate=cost,
    )(x, w1t, b1p, w2t, b2p)

    return out[:B, :C]


def reference_forward(x, w1, b1, w2, b2):
    h = jnp.maximum(x @ w1.T + b1, 0.0)
    return h @ w2.T + b2


if __name__ == "__main__":
    # digits dataset dimensions: 8x8 images flattened -> 64 features, 10 classes
    input_size, hidden_size, num_classes = 64, 32, 10
    batch = 8

    key = jax.random.PRNGKey(0)
    kx, k1, k2, k3, k4 = jax.random.split(key, 5)

    x = jax.random.normal(kx, (batch, input_size), dtype=jnp.float32)

    # Deterministic init mimicking nn.Linear's uniform(-1/sqrt(fan_in), 1/sqrt(fan_in))
    bound1 = 1.0 / (input_size ** 0.5)
    w1 = jax.random.uniform(k1, (hidden_size, input_size), jnp.float32, -bound1, bound1)
    b1 = jax.random.uniform(k2, (hidden_size,), jnp.float32, -bound1, bound1)
    bound2 = 1.0 / (hidden_size ** 0.5)
    w2 = jax.random.uniform(k3, (num_classes, hidden_size), jnp.float32, -bound2, bound2)
    b2 = jax.random.uniform(k4, (num_classes,), jnp.float32, -bound2, bound2)

    out = neural_network_forward(x, w1, b1, w2, b2)
    out = jax.block_until_ready(out)

    ref = reference_forward(x, w1, b1, w2, b2)
    assert out.shape == (batch, num_classes)
    assert jnp.allclose(out, ref, atol=1e-5, rtol=1e-5)

    print("KERNEL_OK")
</pallas_src>

<mosaic_0001>
module attributes {stable_mosaic.version = 11 : i64} {
  func.func @mlp_kernel(%arg0: i32, %arg1: memref<8x64xf32, #tpu.memory_space<vmem>>, %arg2: memref<64x128xf32, #tpu.memory_space<vmem>>, %arg3: memref<1x128xf32, #tpu.memory_space<vmem>>, %arg4: memref<128x128xf32, #tpu.memory_space<vmem>>, %arg5: memref<1x128xf32, #tpu.memory_space<vmem>>, %arg6: memref<8x128xf32, #tpu.memory_space<vmem>>) attributes {dimension_semantics = [#tpu.dimension_semantics<parallel>], iteration_bounds = array<i64: 1>, scalar_prefetch = 0 : i64, scratch_operands = 0 : i64, tpu.core_type = #tpu.core_type<tc>, window_params = [{transform_indices = @transform_0, window_bounds = array<i64: 8, 64>}, {pipeline_mode = #tpu.pipeline_mode<synchronous>, transform_indices = @transform_1, window_bounds = array<i64: 64, 128>}, {pipeline_mode = #tpu.pipeline_mode<synchronous>, transform_indices = @transform_2, window_bounds = array<i64: 1, 128>}, {pipeline_mode = #tpu.pipeline_mode<synchronous>, transform_indices = @transform_3, window_bounds = array<i64: 128, 128>}, {pipeline_mode = #tpu.pipeline_mode<synchronous>, transform_indices = @transform_4, window_bounds = array<i64: 1, 128>}, {transform_indices = @transform_5, window_bounds = array<i64: 8, 128>}]} {
    %c0 = arith.constant 0 : index
    %c0_0 = arith.constant 0 : index
    %0 = vector.load %arg1[%c0, %c0_0] : memref<8x64xf32, #tpu.memory_space<vmem>>, vector<8x64xf32>
    %c0_1 = arith.constant 0 : index
    %c0_2 = arith.constant 0 : index
    %1 = vector.load %arg2[%c0_1, %c0_2] : memref<64x128xf32, #tpu.memory_space<vmem>>, vector<64x128xf32>
    %cst = arith.constant dense<0.000000e+00> : vector<8x128xf32>
    %2 = tpu.matmul %0, %1, %cst {dimension_numbers = #tpu.dot_dimension_numbers<[1], [0], [0], [1], [0, 0, 1, 1], [], []>} : vector<8x64xf32>, vector<64x128xf32>, vector<8x128xf32> -> vector<8x128xf32>
    %c0_3 = arith.constant 0 : index
    %c0_4 = arith.constant 0 : index
    %3 = vector.load %arg3[%c0_3, %c0_4] : memref<1x128xf32, #tpu.memory_space<vmem>>, vector<1x128xf32>
    %4 = vector.broadcast %3 : vector<1x128xf32> to vector<8x128xf32>
    %5 = arith.addf %2, %4 : vector<8x128xf32>
    %cst_5 = arith.constant 0.000000e+00 : f32
    %6 = vector.broadcast %cst_5 : f32 to vector<8x128xf32>
    %7 = arith.maximumf %5, %6 : vector<8x128xf32>
    %c0_6 = arith.constant 0 : index
    %c0_7 = arith.constant 0 : index
    %8 = vector.load %arg4[%c0_6, %c0_7] : memref<128x128xf32, #tpu.memory_space<vmem>>, vector<128x128xf32>
    %cst_8 = arith.constant dense<0.000000e+00> : vector<8x128xf32>
    %9 = tpu.matmul %7, %8, %cst_8 {dimension_numbers = #tpu.dot_dimension_numbers<[1], [0], [0], [1], [0, 0, 1, 1], [], []>} : vector<8x128xf32>, vector<128x128xf32>, vector<8x128xf32> -> vector<8x128xf32>
    %c0_9 = arith.constant 0 : index
    %c0_10 = arith.constant 0 : index
    %10 = vector.load %arg5[%c0_9, %c0_10] : memref<1x128xf32, #tpu.memory_space<vmem>>, vector<1x128xf32>
    %11 = vector.broadcast %10 : vector<1x128xf32> to vector<8x128xf32>
    %12 = arith.addf %9, %11 : vector<8x128xf32>
    %c0_11 = arith.constant 0 : index
    %c0_12 = arith.constant 0 : index
    %13 = vector.load %arg6[%c0_11, %c0_12] : memref<8x128xf32, #tpu.memory_space<vmem>>, vector<8x128xf32>
    tpu.vector_store %arg6[%c0_11, %c0_12], %12 {strides = array<i32>} : memref<8x128xf32, #tpu.memory_space<vmem>>, vector<8x128xf32>,
    return
  }
  func.func @transform_0(%arg0: i32) -> (i32, i32) {
    %c0_i32 = arith.constant 0 : i32
    %c0_i32_0 = arith.constant 0 : i32
    return %arg0, %c0_i32 : i32, i32
  }
  func.func @transform_1(%arg0: i32) -> (i32, i32) {
    %c0_i32 = arith.constant 0 : i32
    %c0_i32_0 = arith.constant 0 : i32
    %c0_i32_1 = arith.constant 0 : i32
    return %c0_i32, %c0_i32_0 : i32, i32
  }
  func.func @transform_2(%arg0: i32) -> (i32, i32) {
    %c0_i32 = arith.constant 0 : i32
    %c0_i32_0 = arith.constant 0 : i32
    %c0_i32_1 = arith.constant 0 : i32
    return %c0_i32, %c0_i32_0 : i32, i32
  }
  func.func @transform_3(%arg0: i32) -> (i32, i32) {
    %c0_i32 = arith.constant 0 : i32
    %c0_i32_0 = arith.constant 0 : i32
    %c0_i32_1 = arith.constant 0 : i32
    return %c0_i32, %c0_i32_0 : i32, i32
  }
  func.func @transform_4(%arg0: i32) -> (i32, i32) {
    %c0_i32 = arith.constant 0 : i32
    %c0_i32_0 = arith.constant 0 : i32
    %c0_i32_1 = arith.constant 0 : i32
    return %c0_i32, %c0_i32_0 : i32, i32
  }
  func.func @transform_5(%arg0: i32) -> (i32, i32) {
    %c0_i32 = arith.constant 0 : i32
    %c0_i32_0 = arith.constant 0 : i32
    return %arg0, %c0_i32 : i32, i32
  }
}

</mosaic_0001>

<bundles_post_ra>
// kernel: neural_network_forward.1
= control target key start
LH: loop header
LB: loop body
LE: loop exit
PB: predicated region body
PF: predicated region fallthrough
CT: control target
= control target key end

     0   :  { %s261_s0 = inlined_call_operand.vmem [shape: f32[8,64], index: 0, kind: input, shape index: {}]   ;;  %s262_s1 = inlined_call_operand.vmem [shape: f32[64,128], index: 1, kind: input, shape index: {}]   ;;  %s263_s2 = inlined_call_operand.vmem [shape: f32[1,128], index: 2, kind: input, shape index: {}]   ;;  %s264_s3 = inlined_call_operand.vmem [shape: f32[128,128], index: 3, kind: input, shape index: {}]   ;;  %s265_s4 = inlined_call_operand.vmem [shape: f32[1,128], index: 4, kind: input, shape index: {}]   ;;  %s266_s5 = inlined_call_operand.hbm [shape: f32[8,128], index: 5, kind: output, shape index: {}]  }
   0x1   :  { %v29_v0 = vld [vmem:[%s262_s1 + $0x38] sm:$0xff]  ;;  %v28_v1 = vld [vmem:[%s262_s1 + $0x30] sm:$0xff]  ;;  %v27_v2 = vld [vmem:[%s262_s1 + $0x28] sm:$0xff] }
   0x2   :  { %46 = vmatpush.msra.mxu0 %v29_v0  ;;  %v74_v3 = vld [vmem:[%s264_s3 + $0x78] sm:$0xff]  ;;  %v73_v4 = vld [vmem:[%s264_s3 + $0x70] sm:$0xff]  ;;  %v26_v5 = vld [vmem:[%s262_s1 + $0x20] sm:$0xff] }
   0x3   :  { %79 = vmatpush.msra.mxu1 %v74_v3  ;;  %v72_v6 = vld [vmem:[%s264_s3 + $0x68] sm:$0xff]  ;;  %v25_v7 = vld [vmem:[%s262_s1 + $0x18] sm:$0xff]  ;;  %v71_v8 = vld [vmem:[%s264_s3 + $0x60] sm:$0xff] }
   0x4   :  { %47 = vmatpush.msra.mxu0 %v28_v1  ;;  %v24_v9 = vld [vmem:[%s262_s1 + $0x10] sm:$0xff] }
   0x5   :  { %80 = vmatpush.msra.mxu1 %v73_v4 }
   0x6   :  { %48 = vmatpush.msra.mxu0 %v27_v2 }
   0x7   :  { %81 = vmatpush.msra.mxu1 %v72_v6 }
   0x8   :  { %49 = vmatpush.msra.mxu0 %v26_v5 }
   0x9   :  { %10 = vsyncpa [#allocation3], 0  ;;  %v70_v10 = vld [vmem:[%s264_s3 + $0x58] sm:$0xff]  ;;  %v23_v11 = vld [vmem:[%s262_s1 + $0x8] sm:$0xff]  ;;  %82 = vmatpush.msra.mxu1 %v71_v8  ;;  %vm34_vm0 = vcmask 523264   ;;  %s146_s20 = smov [#allocation2]  }
   0xa   :  { %50 = vmatpush.msra.mxu0 %v25_v7  ;;  %v69_v12 = vld [vmem:[%s264_s3 + $0x50] sm:$0xff]  ;;  %v22_v13 = vld [vmem:[%s262_s1] sm:$0xff]  ;;  %v68_v15 = vld [vmem:[%s264_s3 + $0x48] sm:$0xff]  ;;  %s105_s21 = sshll.u32 %s146_s20, 4  ;;  %s107_s24 = sshll.u32 %s266_s5, 4  ;;  %s106_s21 = int_to_ptr.vmem [resolvable:$true] %s105_s21  ;;  %s108_s24 = int_to_ptr.hbm [resolvable:$true] %s107_s24 }
   0xb   :  { %83 = vmatpush.msra.mxu1 %v70_v10  ;;  %v21_v14 = vld [vmem:[%s261_s0] sm:$0xff]  ;;  %v66_v17 = vld [vmem:[%s264_s3 + $0x38] sm:$0xff]  ;;  %v65_v18 = vld [vmem:[%s264_s3 + $0x30] sm:$0xff] }
   0xc   :  { %51 = vmatpush.msra.mxu0 %v24_v9  ;;  %v67_v16 = vld [vmem:[%s264_s3 + $0x40] sm:$0xff]  ;;  %v64_v19 = vld [vmem:[%s264_s3 + $0x28] sm:$0xff]  ;;  %v62_v21 = vld [vmem:[%s264_s3 + $0x18] sm:$0xff] }
   0xd   :  { %84 = vmatpush.msra.mxu1 %v69_v12  ;;  %v63_v20 = vld [vmem:[%s264_s3 + $0x20] sm:$0xff]  ;;  %v61_v22 = vld [vmem:[%s264_s3 + $0x10] sm:$0xff]  ;;  %v60_v23 = vld [vmem:[%s264_s3 + $0x8] sm:$0xff] }
   0xe   :  { %52 = vmatpush.msra.mxu0 %v23_v11  ;;  %v59_v24 = vld [vmem:[%s264_s3] sm:$0xff] }
   0xf   :  { %85 = vmatpush.msra.mxu1 %v68_v15  ;;  %v118_v25 = vld [vmem:[%s263_s2] ss:$0 sm:$0xff] }
  0x10   :  { %53 = vmatpush.msra.mxu0 %v22_v13  ;;  %v119_v29 = vld [vmem:[%s265_s4] ss:$0 sm:$0xff] }
  0x11   :  { %116 = vmatmul.msk.f32.vlgmr.msra.gmra.mxu0 %vm34_vm0, %v21_v14  ;;  %86 = vmatpush.msra.mxu1 %v67_v16 }
  0x13   :  { %87 = vmatpush.msra.mxu1 %v66_v17 }
  0x15   :  { %88 = vmatpush.msra.mxu1 %v65_v18 }
  0x17   :  { %89 = vmatpush.msra.mxu1 %v64_v19 }
  0x19   :  { %90 = vmatpush.msra.mxu1 %v63_v20 }
  0x1b   :  { %91 = vmatpush.msra.mxu1 %v62_v21 }
  0x1d   :  { %92 = vmatpush.msra.mxu1 %v61_v22 }
  0x1f   :  { %93 = vmatpush.msra.mxu1 %v60_v23 }
  0x21   :  { %94 = vmatpush.msra.mxu1 %v59_v24 }
  0x8e   :  { %v55_v26 = vpop.f32.mrf.mxu0 }
  0x8f   :  { %v56_v27 = vadd.f32 %v118_v25, %v55_v26 }
  0x91   :  { %v58_v28 = vmax.f32 %v56_v27, 0.0 }
  0x93   :  { %95 = vmatmul.f32.vlgmr.msra.gmra.mxu1 %v58_v28 }
 0x110   :  { %v96_v30 = vpop.f32.mrf.mxu1 }
 0x111   :  { %v97_v31 = vadd.f32 %v119_v29, %v96_v30 }
 0x113   :  { %99 = vst [vmem:[#allocation2] sm:$0xff] %v97_v31 }
 0x114   :  { %110 = dma.vmem_to_hbm [thread:$0]  %s106_s21, 128, %s108_s24, [#allocation3]  }
 0x115   :  { %144 = dma.done.wait [#allocation3], 128  }
 0x116   :  { %145 = vsyncadd [#allocation3], 4294967168 }
 0x117   :  { %115 = vsyncpa [#allocation3], 1 }

</bundles_post_ra>
